<compile_context>
chip_gen: v6e
topology: v6e:2x2x1
jax: 0.10.0
libtpu: 0.0.40
codegen_flags: <defaults>
</compile_context>

<pallas_src>
import functools

import jax
import jax.numpy as jnp
from jax import lax
from jax.experimental import pallas as pl
from jax.experimental.pallas import tpu as pltpu


def _cdiv(a, b):
    return -(-a // b)


def _tpu_budgets():
    """Generation-aware VMEM limit and per-kernel tile budgets (bytes)."""
    vmem_cap = 64 * 1024 * 1024
    try:
        vmem_cap = int(pltpu.get_tpu_info().vmem_capacity_bytes)
    except Exception:
        pass
    if vmem_cap >= 100 * 1024 * 1024:
        # v5e / v6e: 128 MiB VMEM -> big tiles amortize the ~0.35us step cost.
        return {"vmem_limit": 64 << 20, "reduce_tile": 12 << 20, "map_tile": 8 << 20}
    # v7x: 64 MiB VMEM.  Reduction streams 1 array -> larger tile; the map
    # streams 2 (x in + conf out, double-buffered) -> smaller tile.
    return {"vmem_limit": 32 << 20, "reduce_tile": 8 << 20, "map_tile": 4 << 20}


_BUDGET = _tpu_budgets()


def _pick_tile_m(m, n, target_bytes):
    """Row-tile size: full M for tiny arrays, else a multiple of 16 bounded by
    the per-buffer byte budget, with >= 2 grid steps so the pipeline overlaps.
    Lane dim always stays full N (lane-dense, unmasked vst)."""
    # TODO(synk): rows wider than the tile budget (n*4 > target_bytes) would
    # need lane tiling as well; not needed for typical WVN widths.
    row_bytes = max(1, n * 4)
    total = m * row_bytes
    if m <= 16 or total <= (2 << 20):
        return m                                  # one full-extent block
    rows = max(16, (int(target_bytes // row_bytes) // 16) * 16)
    rows = min(rows, max(16, ((m // 2) // 16) * 16))   # at least 2 blocks
    return min(rows, m)


# ---------------------------------------------------------------------------
# Kernel 1 (unfused path): tiled reduction over x_positive -> sum, sum(x^2)
# ---------------------------------------------------------------------------
def _reduce_kernel(xp_ref, psum_ref, psq_ref, acc_s, acc_q, *, tile_m, total_m, bpc):
    i = pl.program_id(1)

    @pl.when(i == 0)
    def _init():
        acc_s[...] = jnp.zeros_like(acc_s)
        acc_q[...] = jnp.zeros_like(acc_q)

    # Mask rows past the true extent (cdiv tail blocks / phantom per-core blocks).
    blk = pl.program_id(0) * bpc + i
    row0 = blk * tile_m
    rows = lax.broadcasted_iota(jnp.int32, (tile_m, 1), 0) + row0
    xp = jnp.where(rows < total_m, xp_ref[...].astype(jnp.float32), 0.0)

    # Steady state: sublane reduce only; pure filler hidden under the input DMA.
    acc_s[...] += jnp.sum(xp, axis=0, keepdims=True)
    acc_q[...] += jnp.sum(xp * xp, axis=0, keepdims=True)

    # One cross-lane reduce + lane-dense store at the last step of this core's slice.
    @pl.when(i == pl.num_programs(1) - 1)
    def _final():
        psum_ref[...] = jnp.broadcast_to(
            jnp.sum(acc_s[...], axis=1, keepdims=True), (1, 128))
        psq_ref[...] = jnp.broadcast_to(
            jnp.sum(acc_q[...], axis=1, keepdims=True), (1, 128))


def _reduce_sum_sumsq(x_positive):
    """Returns (sum, sum-of-squares) scalars over x_positive."""
    if x_positive.ndim != 2:
        x_positive = x_positive.reshape(1, -1)
    m, n = x_positive.shape
    tile_m = _pick_tile_m(m, n, _BUDGET["reduce_tile"])
    nblk = _cdiv(m, tile_m)
    ncores = 2                       # v7x has 2 TCs; harmless elsewhere
    bpc = _cdiv(nblk, ncores)

    kernel = functools.partial(_reduce_kernel, tile_m=tile_m, total_m=m, bpc=bpc)
    part_s, part_q = pl.pallas_call(
        kernel,
        out_shape=(jax.ShapeDtypeStruct((1, ncores * 128), jnp.float32),
                   jax.ShapeDtypeStruct((1, ncores * 128), jnp.float32)),
        grid=(ncores, bpc),
        in_specs=[pl.BlockSpec(
            (tile_m, n),
            lambda c, i: (jnp.minimum(c * bpc + i, nblk - 1), 0))],
        out_specs=(pl.BlockSpec((1, 128), lambda c, i: (0, c)),
                   pl.BlockSpec((1, 128), lambda c, i: (0, c))),
        scratch_shapes=[pltpu.VMEM((1, n), jnp.float32),
                        pltpu.VMEM((1, n), jnp.float32)],
        compiler_params=pltpu.CompilerParams(
            dimension_semantics=("parallel", "arbitrary"),
            vmem_limit_bytes=_BUDGET["vmem_limit"]),
    )(x_positive)
    psum = jnp.sum(part_s[0, ::128])
    psq = jnp.sum(part_q[0, ::128])
    return psum, psq


# ---------------------------------------------------------------------------
# Kernel 2 (unfused path): elementwise confidence map, scalars via SMEM
# ---------------------------------------------------------------------------
def _confidence_kernel(sc_ref, x_ref, o_ref):
    x = x_ref[...].astype(jnp.float32)
    # clip(a - x*inv, 0, 1) == 1 - (clip(x, imin, imax) - imin) / (imax - imin)
    o_ref[...] = jnp.clip(sc_ref[0] - x * sc_ref[1], 0.0, 1.0).astype(o_ref.dtype)


def _confidence_map(x, scalars, out_dtype):
    m, n = x.shape
    tile_m = _pick_tile_m(m, n, _BUDGET["map_tile"])
    return pl.pallas_call(
        _confidence_kernel,
        out_shape=jax.ShapeDtypeStruct((m, n), out_dtype),
        grid=(_cdiv(m, tile_m),),
        in_specs=[pl.BlockSpec(memory_space=pltpu.MemorySpace.SMEM),  # [a, inv]
                  pl.BlockSpec((tile_m, n), lambda i: (i, 0))],
        out_specs=pl.BlockSpec((tile_m, n), lambda i: (i, 0)),
        compiler_params=pltpu.CompilerParams(
            dimension_semantics=("parallel",),
            vmem_limit_bytes=_BUDGET["vmem_limit"]),
    )(scalars, x)


# ---------------------------------------------------------------------------
# Fused kernel (small x_positive): reduction + scalar chain + confidence map
# ---------------------------------------------------------------------------
def _fused_kernel(state_ref, xp_ref, x_ref, conf_ref, stats_ref, ab_ref, *, xp_size):
    # state_ref : SMEM (4,)   = [running_n, running_sum, running_sum_sq, std_factor]
    # xp_ref    : VMEM (Mp,Np) full x_positive block (resident; reduced once)
    # x_ref     : VMEM (tile_m, N) x row-tile
    # conf_ref  : VMEM (tile_m, N) confidence out
    # stats_ref : VMEM (1, 8) out = [n, sum, sumsq, mean, var, std, imax, inv]
    # ab_ref    : VMEM (1, 2) scratch = [imax*inv, inv], persists across steps
    @pl.when(pl.program_id(0) == 0)
    def _stats():
        xp = xp_ref[...].astype(jnp.float32)
        psum = jnp.sum(xp, axis=(0, 1), keepdims=True)        # (1,1)
        psq = jnp.sum(xp * xp, axis=(0, 1), keepdims=True)    # (1,1)
        n_new = jnp.full((1, 1), state_ref[0], jnp.float32) + jnp.float32(xp_size)
        s_new = psum + state_ref[1]
        q_new = psq + state_ref[2]
        mean = s_new / n_new
        var = jnp.maximum(q_new / n_new - mean * mean, 0.0)   # var >= 0 clamp
        std = jnp.sqrt(var)
        shifted = mean + std * state_ref[3]
        imin = jnp.maximum(shifted - std, 0.0)
        imax = shifted + std
        inv = 1.0 / jnp.maximum(imax - imin, 1e-6)            # div-by-0 guard
        ab_ref[0:1, 0:1] = imax * inv
        ab_ref[0:1, 1:2] = inv
        stats_ref[0:1, 0:1] = n_new
        stats_ref[0:1, 1:2] = s_new
        stats_ref[0:1, 2:3] = q_new
        stats_ref[0:1, 3:4] = mean
        stats_ref[0:1, 4:5] = var
        stats_ref[0:1, 5:6] = std
        stats_ref[0:1, 6:7] = imax
        stats_ref[0:1, 7:8] = inv

    x = x_ref[...].astype(jnp.float32)
    a = ab_ref[0:1, 0:1]
    inv = ab_ref[0:1, 1:2]
    conf_ref[...] = jnp.clip(a - x * inv, 0.0, 1.0).astype(conf_ref.dtype)


@functools.partial(jax.jit, static_argnames=("out_dtype",))
def _update_running_mean_fused(x, x_positive, running_n, running_sum,
                               running_sumsq, std_factor, out_dtype=jnp.float32):
    if x_positive.ndim != 2:
        x_positive = x_positive.reshape(1, -1)
    m, n = x.shape
    mp, np_ = x_positive.shape
    tile_m = _pick_tile_m(m, n, _BUDGET["map_tile"])
    state = jnp.concatenate(
        [running_n, running_sum, running_sumsq,
         jnp.reshape(std_factor, (1,))]).astype(jnp.float32)
    kernel = functools.partial(_fused_kernel, xp_size=x_positive.size)
    conf, stats = pl.pallas_call(
        kernel,
        out_shape=(jax.ShapeDtypeStruct((m, n), out_dtype),
                   jax.ShapeDtypeStruct((1, 8), jnp.float32)),
        grid=(_cdiv(m, tile_m),),
        in_specs=[pl.BlockSpec(memory_space=pltpu.MemorySpace.SMEM),  # state
                  pl.BlockSpec((mp, np_), lambda i: (0, 0)),          # x_positive
                  pl.BlockSpec((tile_m, n), lambda i: (i, 0))],       # x tile
        out_specs=(pl.BlockSpec((tile_m, n), lambda i: (i, 0)),
                   pl.BlockSpec((1, 8), lambda i: (0, 0))),
        scratch_shapes=[pltpu.VMEM((1, 2), jnp.float32)],
        compiler_params=pltpu.CompilerParams(
            # "arbitrary": step 0 seeds the scalars every later step reads.
            dimension_semantics=("arbitrary",),
            vmem_limit_bytes=_BUDGET["vmem_limit"]),
    )(state, x_positive, x)
    s = stats[0]
    return conf, (s[0:1], s[1:2], s[2:3]), s[3:4], s[4:5], s[5:6]


@functools.partial(jax.jit, static_argnames=("out_dtype",))
def _update_running_mean_unfused(x, x_positive, running_n, running_sum,
                                 running_sumsq, std_factor, out_dtype=jnp.float32):
    psum, psq = _reduce_sum_sumsq(x_positive)              # Pallas reduction
    n_new = running_n + jnp.float32(x_positive.size)
    s_new = running_sum + psum
    q_new = running_sumsq + psq
    mean = s_new / n_new
    var = jnp.maximum(q_new / n_new - mean * mean, 0.0)
    std = jnp.sqrt(var)
    shifted = mean + std * std_factor
    imin = jnp.maximum(shifted - std, 0.0)
    imax = shifted + std
    inv = 1.0 / jnp.maximum(imax - imin, 1e-6)
    scalars = jnp.concatenate([imax * inv, inv]).astype(jnp.float32)  # (2,)
    conf = _confidence_map(x, scalars, out_dtype)          # Pallas map kernel
    return conf, (n_new, s_new, q_new), mean, var, std


class ConfidenceGenerator:
    """Functional port of ConfidenceGenerator(method='running_mean')."""

    def __init__(self, std_factor=0.7, method="running_mean",
                 out_dtype=jnp.float32, fuse_max_xpos_bytes=2 << 20):
        if method != "running_mean":
            # TODO(synk): kalman_filter / moving_average / latest_measurement not ported.
            raise ValueError("Only method='running_mean' is implemented")
        self.std_factor = float(std_factor)
        self.out_dtype = out_dtype  # set jnp.bfloat16 to halve HBM write traffic
        self.fuse_max_xpos_bytes = int(fuse_max_xpos_bytes)
        self.mean = jnp.zeros((1,), jnp.float32)
        self.var = jnp.ones((1, 1), jnp.float32)
        self.std = jnp.ones((1,), jnp.float32)
        self.running_n = jnp.zeros((1,), jnp.float32)
        self.running_sum = jnp.zeros((1,), jnp.float32)
        self.running_sum_of_squares = jnp.zeros((1,), jnp.float32)

    def update(self, x, x_positive, step=0, log_step=False):
        """Mirrors torch update_running_mean: update stats, map x -> confidence."""
        # TODO(synk): disk logging (torch.save) not ported.
        assert x.ndim == 2, "expected x of shape (BS, N)"
        xp_bytes = x_positive.size * jnp.dtype(x_positive.dtype).itemsize
        fn = (_update_running_mean_fused if xp_bytes <= self.fuse_max_xpos_bytes
              else _update_running_mean_unfused)
        conf, state, mean, var, std = fn(
            x, x_positive, self.running_n, self.running_sum,
            self.running_sum_of_squares, jnp.float32(self.std_factor),
            out_dtype=self.out_dtype)
        self.running_n, self.running_sum, self.running_sum_of_squares = state
        self.mean = mean
        self.var = jnp.reshape(var, (1, 1))
        self.std = std
        return conf

    def inference_without_update(self, x):
        shifted = self.mean + self.std * self.std_factor
        imin = jnp.maximum(shifted - self.std, 0.0)
        imax = shifted + self.std
        inv = 1.0 / jnp.maximum(imax - imin, 1e-6)
        scalars = jnp.concatenate([imax * inv, inv]).astype(jnp.float32)
        return _confidence_map(x, scalars, self.out_dtype)

    def reset(self):
        self.running_n = jnp.zeros((1,), jnp.float32)
        self.running_sum = jnp.zeros((1,), jnp.float32)
        self.running_sum_of_squares = jnp.zeros((1,), jnp.float32)

    def get_dict(self):
        return {"mean": self.mean, "var": self.var, "std": self.std}


if __name__ == "__main__":
    key = jax.random.PRNGKey(0)
    k1, k2, k3 = jax.random.split(key, 3)
    # x: (BS, N) error predictions; x_positive: positive-labelled subset.
    x = jax.random.uniform(k1, (16, 256), jnp.float32) * 2.0
    x_positive = jax.random.uniform(k2, (8, 128), jnp.float32)
    x_positive2 = jax.random.uniform(k3, (8, 128), jnp.float32) * 0.5

    def ref_update(x_in, xp, state, std_factor=0.7):
        """Pure-JAX reference of torch update_running_mean (float32 stats)."""
        n0, s0, q0 = state
        xp = xp.astype(jnp.float32)
        n = n0 + xp.size
        s = s0 + jnp.sum(xp)
        q = q0 + jnp.sum(xp * xp)
        mean = s / n
        var = jnp.maximum(q / n - mean * mean, 0.0)
        std = jnp.sqrt(var)
        shifted = mean + std * std_factor
        imin = jnp.maximum(shifted - std, 0.0)
        imax = shifted + std
        xc = jnp.clip(x_in, imin, imax)
        conf = 1.0 - (xc - imin) / (imax - imin)
        return conf, (n, s, q), mean, std

    # Exercise both the fused single-call path and the two-kernel path.
    for fuse_bytes in (2 << 20, 0):
        cg = ConfidenceGenerator(std_factor=0.7, fuse_max_xpos_bytes=fuse_bytes)
        state = (jnp.float32(0.0), jnp.float32(0.0), jnp.float32(0.0))
        for xp in (x_positive, x_positive2):
            conf = jax.block_until_ready(cg.update(x, xp))
            conf_ref, state, mean_ref, std_ref = ref_update(x, xp, state)
            assert conf.shape == x.shape and conf.dtype == jnp.float32
            assert bool(jnp.all(jnp.isfinite(conf)))
            assert bool(jnp.all((conf >= 0.0) & (conf <= 1.0)))
            err = float(jnp.max(jnp.abs(conf - conf_ref)))
            assert err < 2e-3, f"confidence mismatch: {err}"
            assert bool(jnp.allclose(cg.mean[0], mean_ref, rtol=1e-3, atol=1e-3))
            assert bool(jnp.allclose(cg.std[0], std_ref, rtol=1e-3, atol=1e-3))

    print("KERNEL_OK")
</pallas_src>

<mosaic_0001>
module attributes {stable_mosaic.version = 11 : i64} {
  func.func @_fused_kernel(%arg0: i32, %arg1: memref<4xf32, #tpu.memory_space<smem>>, %arg2: memref<8x128xf32, #tpu.memory_space<vmem>>, %arg3: memref<16x256xf32, #tpu.memory_space<vmem>>, %arg4: memref<16x256xf32, #tpu.memory_space<vmem>>, %arg5: memref<1x8xf32, #tpu.memory_space<vmem>>, %arg6: memref<1x2xf32, #tpu.memory_space<vmem>>) attributes {dimension_semantics = [#tpu.dimension_semantics<arbitrary>], iteration_bounds = array<i64: 1>, scalar_prefetch = 0 : i64, scratch_operands = 1 : i64, tpu.core_type = #tpu.core_type<tc>, window_params = [{transform_indices = @transform_0, window_bounds = array<i64: 4>}, {pipeline_mode = #tpu.pipeline_mode<synchronous>, transform_indices = @transform_1, window_bounds = array<i64: 8, 128>}, {transform_indices = @transform_2, window_bounds = array<i64: 16, 256>}, {transform_indices = @transform_3, window_bounds = array<i64: 16, 256>}, {pipeline_mode = #tpu.pipeline_mode<synchronous>, transform_indices = @transform_4, window_bounds = array<i64: 1, 8>}]} {
    %c0_i32 = arith.constant 0 : i32
    %0 = arith.cmpi eq, %arg0, %c0_i32 : i32
    %1 = arith.extui %0 : i1 to i32
    %c0_i32_0 = arith.constant 0 : i32
    %2 = arith.cmpi ne, %1, %c0_i32_0 : i32
    scf.if %2 {
      %c0_8 = arith.constant 0 : index
      %c0_9 = arith.constant 0 : index
      %15 = vector.load %arg2[%c0_8, %c0_9] : memref<8x128xf32, #tpu.memory_space<vmem>>, vector<8x128xf32>
      %16 = vector.shape_cast %15 : vector<8x128xf32> to vector<1x8x128xf32>
      %cst_10 = arith.constant dense<0.000000e+00> : vector<1xf32>
      %17 = vector.multi_reduction <add>, %16, %cst_10 [1, 2] : vector<1x8x128xf32> to vector<1xf32>
      %18 = vector.shape_cast %17 : vector<1xf32> to vector<1x1x1xf32>
      %19 = vector.extract %18[0, 0, 0] : f32 from vector<1x1x1xf32>
      %20 = vector.broadcast %19 : f32 to vector<1x1xf32>
      %21 = arith.mulf %15, %15 : vector<8x128xf32>
      %22 = vector.shape_cast %21 : vector<8x128xf32> to vector<1x8x128xf32>
      %cst_11 = arith.constant dense<0.000000e+00> : vector<1xf32>
      %23 = vector.multi_reduction <add>, %22, %cst_11 [1, 2] : vector<1x8x128xf32> to vector<1xf32>
      %24 = vector.shape_cast %23 : vector<1xf32> to vector<1x1x1xf32>
      %25 = vector.extract %24[0, 0, 0] : f32 from vector<1x1x1xf32>
      %26 = vector.broadcast %25 : f32 to vector<1x1xf32>
      %c0_12 = arith.constant 0 : index
      %27 = memref.load %arg1[%c0_12] : memref<4xf32, #tpu.memory_space<smem>>
      %28 = vector.broadcast %27 : f32 to vector<1x1xf32>
      %cst_13 = arith.constant 1.024000e+03 : f32
      %29 = vector.broadcast %cst_13 : f32 to vector<1x1xf32>
      %30 = arith.addf %28, %29 : vector<1x1xf32>
      %c1_14 = arith.constant 1 : index
      %31 = memref.load %arg1[%c1_14] : memref<4xf32, #tpu.memory_space<smem>>
      %32 = vector.broadcast %31 : f32 to vector<1x1xf32>
      %33 = arith.addf %20, %32 : vector<1x1xf32>
      %c2 = arith.constant 2 : index
      %34 = memref.load %arg1[%c2] : memref<4xf32, #tpu.memory_space<smem>>
      %35 = vector.broadcast %34 : f32 to vector<1x1xf32>
      %36 = arith.addf %26, %35 : vector<1x1xf32>
      %37 = arith.divf %33, %30 : vector<1x1xf32>
      %38 = arith.divf %36, %30 : vector<1x1xf32>
      %39 = arith.mulf %37, %37 : vector<1x1xf32>
      %40 = arith.subf %38, %39 : vector<1x1xf32>
      %cst_15 = arith.constant 0.000000e+00 : f32
      %41 = vector.broadcast %cst_15 : f32 to vector<1x1xf32>
      %42 = arith.maximumf %40, %41 : vector<1x1xf32>
      %43 = math.sqrt %42 : vector<1x1xf32>
      %c3 = arith.constant 3 : index
      %44 = memref.load %arg1[%c3] : memref<4xf32, #tpu.memory_space<smem>>
      %45 = vector.broadcast %44 : f32 to vector<1x1xf32>
      %46 = arith.mulf %43, %45 : vector<1x1xf32>
      %47 = arith.addf %37, %46 : vector<1x1xf32>
      %48 = arith.subf %47, %43 : vector<1x1xf32>
      %cst_16 = arith.constant 0.000000e+00 : f32
      %49 = vector.broadcast %cst_16 : f32 to vector<1x1xf32>
      %50 = arith.maximumf %48, %49 : vector<1x1xf32>
      %51 = arith.addf %47, %43 : vector<1x1xf32>
      %52 = arith.subf %51, %50 : vector<1x1xf32>
      %cst_17 = arith.constant 9.99999997E-7 : f32
      %53 = vector.broadcast %cst_17 : f32 to vector<1x1xf32>
      %54 = arith.maximumf %52, %53 : vector<1x1xf32>
      %cst_18 = arith.constant 1.000000e+00 : f32
      %55 = vector.broadcast %cst_18 : f32 to vector<1x1xf32>
      %56 = arith.divf %55, %54 : vector<1x1xf32>
      %57 = arith.mulf %51, %56 : vector<1x1xf32>
      %c0_19 = arith.constant 0 : index
      %c0_20 = arith.constant 0 : index
      %58 = vector.load %arg6[%c0_19, %c0_20] : memref<1x2xf32, #tpu.memory_space<vmem>>, vector<1x1xf32>
      tpu.vector_store %arg6[%c0_19, %c0_20], %57 {strides = array<i32>} : memref<1x2xf32, #tpu.memory_space<vmem>>, vector<1x1xf32>,
      %c0_21 = arith.constant 0 : index
      %c1_22 = arith.constant 1 : index
      %59 = vector.load %arg6[%c0_21, %c1_22] : memref<1x2xf32, #tpu.memory_space<vmem>>, vector<1x1xf32>
      tpu.vector_store %arg6[%c0_21, %c1_22], %56 {strides = array<i32>} : memref<1x2xf32, #tpu.memory_space<vmem>>, vector<1x1xf32>,
      %c0_23 = arith.constant 0 : index
      %c0_24 = arith.constant 0 : index
      %60 = vector.load %arg5[%c0_23, %c0_24] : memref<1x8xf32, #tpu.memory_space<vmem>>, vector<1x1xf32>
      tpu.vector_store %arg5[%c0_23, %c0_24], %30 {strides = array<i32>} : memref<1x8xf32, #tpu.memory_space<vmem>>, vector<1x1xf32>,
      %c0_25 = arith.constant 0 : index
      %c1_26 = arith.constant 1 : index
      %61 = vector.load %arg5[%c0_25, %c1_26] : memref<1x8xf32, #tpu.memory_space<vmem>>, vector<1x1xf32>
      tpu.vector_store %arg5[%c0_25, %c1_26], %33 {strides = array<i32>} : memref<1x8xf32, #tpu.memory_space<vmem>>, vector<1x1xf32>,
      %c0_27 = arith.constant 0 : index
      %c2_28 = arith.constant 2 : index
      %62 = vector.load %arg5[%c0_27, %c2_28] : memref<1x8xf32, #tpu.memory_space<vmem>>, vector<1x1xf32>
      tpu.vector_store %arg5[%c0_27, %c2_28], %36 {strides = array<i32>} : memref<1x8xf32, #tpu.memory_space<vmem>>, vector<1x1xf32>,
      %c0_29 = arith.constant 0 : index
      %c3_30 = arith.constant 3 : index
      %63 = vector.load %arg5[%c0_29, %c3_30] : memref<1x8xf32, #tpu.memory_space<vmem>>, vector<1x1xf32>
      tpu.vector_store %arg5[%c0_29, %c3_30], %37 {strides = array<i32>} : memref<1x8xf32, #tpu.memory_space<vmem>>, vector<1x1xf32>,
      %c0_31 = arith.constant 0 : index
      %c4 = arith.constant 4 : index
      %64 = vector.load %arg5[%c0_31, %c4] : memref<1x8xf32, #tpu.memory_space<vmem>>, vector<1x1xf32>
      tpu.vector_store %arg5[%c0_31, %c4], %42 {strides = array<i32>} : memref<1x8xf32, #tpu.memory_space<vmem>>, vector<1x1xf32>,
      %c0_32 = arith.constant 0 : index
      %c5 = arith.constant 5 : index
      %65 = vector.load %arg5[%c0_32, %c5] : memref<1x8xf32, #tpu.memory_space<vmem>>, vector<1x1xf32>
      tpu.vector_store %arg5[%c0_32, %c5], %43 {strides = array<i32>} : memref<1x8xf32, #tpu.memory_space<vmem>>, vector<1x1xf32>,
      %c0_33 = arith.constant 0 : index
      %c6 = arith.constant 6 : index
      %66 = vector.load %arg5[%c0_33, %c6] : memref<1x8xf32, #tpu.memory_space<vmem>>, vector<1x1xf32>
      tpu.vector_store %arg5[%c0_33, %c6], %51 {strides = array<i32>} : memref<1x8xf32, #tpu.memory_space<vmem>>, vector<1x1xf32>,
      %c0_34 = arith.constant 0 : index
      %c7 = arith.constant 7 : index
      %67 = vector.load %arg5[%c0_34, %c7] : memref<1x8xf32, #tpu.memory_space<vmem>>, vector<1x1xf32>
      tpu.vector_store %arg5[%c0_34, %c7], %56 {strides = array<i32>} : memref<1x8xf32, #tpu.memory_space<vmem>>, vector<1x1xf32>,
    } else {
    }
    %c0 = arith.constant 0 : index
    %c0_1 = arith.constant 0 : index
    %3 = vector.load %arg3[%c0, %c0_1] : memref<16x256xf32, #tpu.memory_space<vmem>>, vector<16x256xf32>
    %c0_2 = arith.constant 0 : index
    %c0_3 = arith.constant 0 : index
    %4 = vector.load %arg6[%c0_2, %c0_3] : memref<1x2xf32, #tpu.memory_space<vmem>>, vector<1x1xf32>
    %c0_4 = arith.constant 0 : index
    %c1 = arith.constant 1 : index
    %5 = vector.load %arg6[%c0_4, %c1] : memref<1x2xf32, #tpu.memory_space<vmem>>, vector<1x1xf32>
    %6 = vector.broadcast %5 : vector<1x1xf32> to vector<16x256xf32>
    %7 = arith.mulf %3, %6 : vector<16x256xf32>
    %8 = vector.broadcast %4 : vector<1x1xf32> to vector<16x256xf32>
    %9 = arith.subf %8, %7 : vector<16x256xf32>
    %cst = arith.constant 0.000000e+00 : f32
    %cst_5 = arith.constant 1.000000e+00 : f32
    %10 = vector.broadcast %cst : f32 to vector<16x256xf32>
    %11 = arith.maximumf %10, %9 : vector<16x256xf32>
    %12 = vector.broadcast %cst_5 : f32 to vector<16x256xf32>
    %13 = arith.minimumf %12, %11 : vector<16x256xf32>
    %c0_6 = arith.constant 0 : index
    %c0_7 = arith.constant 0 : index
    %14 = vector.load %arg4[%c0_6, %c0_7] : memref<16x256xf32, #tpu.memory_space<vmem>>, vector<16x256xf32>
    tpu.vector_store %arg4[%c0_6, %c0_7], %13 {strides = array<i32>} : memref<16x256xf32, #tpu.memory_space<vmem>>, vector<16x256xf32>,
    return
  }
  func.func @transform_0(%arg0: i32) -> i32 {
    %c0_i32 = arith.constant 0 : i32
    %c0_i32_0 = arith.constant 0 : i32
    return %c0_i32 : i32
  }
  func.func @transform_1(%arg0: i32) -> (i32, i32) {
    %c0_i32 = arith.constant 0 : i32
    %c0_i32_0 = arith.constant 0 : i32
    %c0_i32_1 = arith.constant 0 : i32
    return %c0_i32, %c0_i32_0 : i32, i32
  }
  func.func @transform_2(%arg0: i32) -> (i32, i32) {
    %c0_i32 = arith.constant 0 : i32
    %c0_i32_0 = arith.constant 0 : i32
    return %arg0, %c0_i32 : i32, i32
  }
  func.func @transform_3(%arg0: i32) -> (i32, i32) {
    %c0_i32 = arith.constant 0 : i32
    %c0_i32_0 = arith.constant 0 : i32
    return %arg0, %c0_i32 : i32, i32
  }
  func.func @transform_4(%arg0: i32) -> (i32, i32) {
    %c0_i32 = arith.constant 0 : i32
    %c0_i32_0 = arith.constant 0 : i32
    %c0_i32_1 = arith.constant 0 : i32
    return %c0_i32, %c0_i32_0 : i32, i32
  }
}

</mosaic_0001>

<bundles_post_ra>
// kernel: _update_running_mean_fused.1
= control target key start
LH: loop header
LB: loop body
LE: loop exit
PB: predicated region body
PF: predicated region fallthrough
CT: control target
= control target key end

     0   :  { %10 = vsyncpa [#allocation6], 0  ;;  %s344_s0 = inlined_call_operand.vmem [shape: f32[4], index: 0, kind: input, shape index: {}]   ;;  %s345_s1 = inlined_call_operand.vmem [shape: f32[8,128], index: 1, kind: input, shape index: {}]   ;;  %s346_s2 = inlined_call_operand.hbm [shape: f32[16,256], index: 2, kind: input, shape index: {}]   ;;  %s347_s3 = inlined_call_operand.hbm [shape: f32[16,256], index: 3, kind: output, shape index: {0}]   ;;  %s348_s4 = inlined_call_operand.vmem [shape: f32[1,8], index: 4, kind: output, shape index: {1}]  }
   0x1   :  { %11 = vsyncpa [#allocation4], 0 }
   0x2   :  { %12 = vsyncpa [#allocation5], 0  ;;  %s19_s17 = sshll.u32 %s344_s0, 4  ;;  %s20_s17 = int_to_ptr.vmem [resolvable:$true] %s19_s17 }
   0x3   :  { %s206_s18 = scalar_lea.vmem %s20_s17, 16  ;;  %p211_p1 = scmp.lt.s32.totalorder %s20_s17, %s20_s17 }
   0x4   :  { %p207_p0 = scmp.ne.s32.totalorder %s20_s17, %s206_s18  ;;  %p212_p2 = scmp.lt.s32.totalorder %s206_s18, %s206_s18 }
   0x6   :  { %p213_p3 = por %p212_p2, %p211_p1 }
   0x8   :  { %p214_p4 = pnand %p213_p3, %p207_p0 }
   0xa   :  { %217 = shalt.err (!%p214_p4)
}
   0xb   :  { %s264_s19 = smov [#allocation3]   ;;  %s265_s20 = smov [#allocation7]  }
   0xc   :  { %22 = dma.vmem_to_smem %s20_s17, 16, %s264_s19, [#allocation6]  }
   0xd   :  { %s30_s21 = sshll.u32 %s265_s20, 4  ;;  %s31_s21 = int_to_ptr.vmem [resolvable:$true] %s30_s21 }
   0xe   :  { %s226_s22 = scalar_lea.vmem %s31_s21, 512  ;;  %p231_p6 = scmp.lt.s32.totalorder %s31_s21, %s31_s21 }
   0xf   :  { %p227_p5 = scmp.ne.s32.totalorder %s31_s21, %s226_s22  ;;  %p232_p7 = scmp.lt.s32.totalorder %s226_s22, %s226_s22 }
  0x11   :  { %p233_p8 = por %p232_p7, %p231_p6 }
  0x13   :  { %p234_p9 = pnand %p233_p8, %p227_p5 }
  0x15   :  { %237 = shalt.err (!%p234_p9)
}
  0x16   :  { %s266_s0 = smov 256   ;;  %s267_s23 = smov 16  }
  0x17   :  { %36 = dma.hbm_to_vmem [thread:$0]  %s346_s2, 512, %s31_s21, [#allocation4], %s266_s0, %s266_s0, %s267_s23  }
  0x18   :  { %258 = dma.done.wait [#allocation6], 16  }
  0x19   :  { %259 = vsyncadd [#allocation6], 4294967280 }
  0x1a   :  { %260 = dma.done.wait [#allocation4], 512  }
  0x1b   :  { %261 = vsyncadd [#allocation4], 4294966784 }
  0x1c   :  { %43 = sfence }
  0x1d   :  { %v48_v0 = vld [vmem:[%s345_s1] sm:$0xff]  ;;  %s70_s28 = sld [smem:[#allocation3]]  ;;  %vm104_vm0 = vcmask 0   ;;  %v268_v4 = vmov 1   ;;  %v269_v9 = vmov 0   ;;  %vm106_vm1 = vcmask 8200  }
  0x1e   :  { %49 = vadd.xlane.f32.xlu0 %v48_v0  ;;  %v59_v1 = vmul.f32 %v48_v0, %v48_v0  ;;  %197 = vset.pattern.permute.xlu1 %v268_v4  ;;  %s182_s1 = sld [smem:[#allocation3 + $0x1]]  ;;  %vm110_vm2 = vcmask 16400   ;;  %vm112_vm3 = vcmask 24600   ;;  %vm114_vm4 = vcmask 32800   ;;  %v122_v49 = vld [vmem:[#allocation7] sm:$0xff]  ;;  %v123_v50 = vld [vmem:[#allocation7 + $0x8] sm:$0xff] }
  0x1f   :  { %199 = vset.pattern.permute.xlu0 %v269_v9  ;;  %s183_s2 = sld [smem:[#allocation3 + $0x2]]  ;;  %vm116_vm6 = vcmask 41000   ;;  %vm118_vm8 = vcmask 49200   ;;  %vm120_vm9 = vcmask 57400   ;;  %v124_v51 = vld [vmem:[#allocation7 + $0x10] sm:$0xff]  ;;  %v125_v52 = vld [vmem:[#allocation7 + $0x18] sm:$0xff] }
  0x20   :  { %s184_s15 = sld [smem:[#allocation3 + $0x3]] }
  0x22   :  { %60 = vadd.xlane.f32.xlu0 %v59_v1 }
  0x23   :  { %v71_v2 = vstv %s70_s28 }
  0x24   :  { %v72_v3 = vadd.f32 1024.0, %v71_v2  ;;  %v74_v20 = vstv %s182_s1 }
  0x25   :  { %v77_v24 = vstv %s183_s2 }
  0x26   :  { %108 = vst.msk [vmem:[%s348_s4] sm:$0x1] %vm104_vm0, %v72_v3  ;;  %200 = vrcp.f32 %v72_v3  ;;  %v93_v35 = vstv %s184_s15 }
  0x33   :  { %v201_v21 = vpop.eup %200 }
  0xa7   :  { %v50_v5 = vpop.xlane.xlu0 %49 }
  0xa8   :  { %v51_v6 = vrot.slane %v50_v5, 4 }
  0xaa   :  { %v52_v7 = vadd.f32 %v51_v6, %v50_v5 }
  0xab   :  { %v61_v8 = vpop.xlane.xlu0 %60 }
  0xac   :  { %v53_v10 = vrot.slane %v52_v7, 2  ;;  %v62_v11 = vrot.slane %v61_v8, 4 }
  0xae   :  { %v63_v12 = vadd.f32 %v62_v11, %v61_v8  ;;  %v54_v13 = vadd.f32 %v53_v10, %v52_v7 }
  0xb0   :  { %v64_v14 = vrot.slane %v63_v12, 2  ;;  %v55_v15 = vrot.slane %v54_v13, 1 }
  0xb2   :  { %v65_v16 = vadd.f32 %v64_v14, %v63_v12  ;;  %v56_v17 = vadd.f32 %v55_v15, %v54_v13 }
  0xb4   :  { %186 = vpush %v56_v17  ;;  %v66_v18 = vrot.slane %v65_v16, 1 }
  0xb6   :  { %v67_v19 = vadd.f32 %v66_v18, %v65_v16 }
  0xb8   :  { %188 = vpush %v67_v19 }
  0xe5   :  { %s187_s5 = spop %186 }
  0xe6   :  { %v58_v22 = vstv %s187_s5 }
  0xe7   :  { %v75_v23 = vadd.f32 %v74_v20, %v58_v22 }
  0xe9   :  { %v80_v25 = vmul.f32 %v201_v21, %v75_v23  ;;  %109 = vst.msk [vmem:[%s348_s4] sm:$0x1] %vm106_vm1, %v75_v23  ;;  %s189_s8 = spop %188 }
  0xea   :  { %v69_v26 = vstv %s189_s8 }
  0xeb   :  { %v78_v27 = vadd.f32 %v77_v24, %v69_v26  ;;  %v82_v29 = vmul.f32 %v80_v25, %v80_v25 }
  0xed   :  { %v81_v28 = vmul.f32 %v201_v21, %v78_v27  ;;  %111 = vst.msk [vmem:[%s348_s4] sm:$0x1] %vm110_vm2, %v78_v27 }
  0xee   :  { %113 = vst.msk [vmem:[%s348_s4] sm:$0x1] %vm112_vm3, %v80_v25 }
  0xef   :  { %v83_v30 = vsub.f32 %v81_v28, %v82_v29 }
  0xf1   :  { %v84_v31 = vmax.f32 %v83_v30, 0.0 }
  0xf3   :  { %202 = vrsqrt.f32 %v84_v31  ;;  %115 = vst.msk [vmem:[%s348_s4] sm:$0x1] %vm114_vm4, %v84_v31  ;;  %vm87_vm5 = vcmp.eq.f32.partialorder %v84_v31, inf  ;;  %v90_v34 = vand.u32 2147483648, %v84_v31  ;;  %vm89_vm7 = vcmp.eq.f32.partialorder %v84_v31, 0.0 }
 0x100   :  { %v203_v32 = vpop.eup %202 }
 0x101   :  { %v86_v33 = vmul.f32 %v203_v32, %v84_v31 }
 0x103   :  { %v88_v36 = vsel %vm87_vm5, %v84_v31, %v86_v33 }
 0x104   :  { %v91_v37 = vsel %vm89_vm7, %v90_v34, %v88_v36 }
 0x105   :  { %v94_v38 = vmul.f32 %v93_v35, %v91_v37  ;;  %117 = vst.msk [vmem:[%s348_s4] sm:$0x1] %vm116_vm6, %v91_v37 }
 0x107   :  { %v95_v39 = vadd.f32 %v94_v38, %v80_v25 }
 0x109   :  { %v96_v40 = vsub.f32 %v95_v39, %v91_v37  ;;  %v98_v41 = vadd.f32 %v95_v39, %v91_v37 }
 0x10b   :  { %v97_v42 = vmax.f32 %v96_v40, 0.0  ;;  %119 = vst.msk [vmem:[%s348_s4] sm:$0x1] %vm118_vm8, %v98_v41 }
 0x10d   :  { %v99_v43 = vsub.f32 %v98_v41, %v97_v42 }
 0x10f   :  { %v100_v44 = vmax.f32 %v99_v43, 1e-06 }
 0x111   :  { %204 = vrcp.f32 %v100_v44 }
 0x11e   :  { %v205_v45 = vpop.eup %204 }
 0x11f   :  { %v103_v46 = vmul.f32 %v205_v45, %v98_v41  ;;  %121 = vst.msk [vmem:[%s348_s4] sm:$0x1] %vm120_vm9, %v205_v45  ;;  %s270_s4 = smov [#allocation8]  }
 0x120   :  { %s165_s22 = sshll.u32 %s270_s4, 4  ;;  %s166_s22 = int_to_ptr.vmem [resolvable:$true] %s165_s22 }
 0x121   :  { %105 = vst.msk [vmem:[#allocation2] sm:$0x1] %vm104_vm0, %v103_v46  ;;  %s238_s24 = scalar_lea.vmem %s166_s22, 512  ;;  %p243_p11 = scmp.lt.s32.totalorder %s166_s22, %s166_s22 }
 0x122   :  { %107 = vst.msk [vmem:[#allocation2] sm:$0x1] %vm106_vm1, %v205_v45  ;;  %p239_p10 = scmp.ne.s32.totalorder %s166_s22, %s238_s24  ;;  %p244_p12 = scmp.lt.s32.totalorder %s238_s24, %s238_s24 }
 0x124   :  { %p245_p13 = por %p244_p12, %p243_p11 }
 0x126   :  { %p246_p0 = pnand %p245_p13, %p239_p10 }
 0x129   :  { %v185_v47 = vld [vmem:[#allocation2] ss:$0 sm:$0xff] }
 0x12a   :  { %133 = vperm.xlu1 %197, %v185_v47  }
 0x12e   :  { %198 = vset.pattern.permute.xlu1 %v269_v9 }
 0x12f   :  { %141 = vperm.xlu1 %198, %v185_v47  }
 0x1a5   :  { %v134_v48 = vpop.permute.xlu1 %133 }
 0x1a6   :  { %v136_v53 = vmul.f32 %v134_v48, %v122_v49  ;;  %v137_v54 = vmul.f32 %v134_v48, %v123_v50  ;;  %v138_v55 = vmul.f32 %v134_v48, %v124_v51  ;;  %v139_v56 = vmul.f32 %v134_v48, %v125_v52 }
 0x1aa   :  { %v142_v57 = vpop.permute.xlu1 %141 }
 0x1ab   :  { %v144_v58 = vsub.f32 %v142_v57, %v136_v53  ;;  %v145_v59 = vsub.f32 %v142_v57, %v137_v54  ;;  %v146_v60 = vsub.f32 %v142_v57, %v138_v55  ;;  %v147_v61 = vsub.f32 %v142_v57, %v139_v56 }
 0x1ad   :  { %v148_v62 = vmax.f32 %v144_v58, 0.0  ;;  %v149_v63 = vmax.f32 %v145_v59, 0.0  ;;  %v150_v0 = vmax.f32 %v146_v60, 0.0  ;;  %v151_v1 = vmax.f32 %v147_v61, 0.0 }
 0x1af   :  { %v152_v2 = vmin.f32 %v148_v62, 1.0  ;;  %v153_v3 = vmin.f32 %v149_v63, 1.0  ;;  %v154_v4 = vmin.f32 %v150_v0, 1.0  ;;  %v155_v5 = vmin.f32 %v151_v1, 1.0 }
 0x1b1   :  { %156 = vst [vmem:[#allocation8] sm:$0xff] %v152_v2  ;;  %157 = vst [vmem:[#allocation8 + $0x8] sm:$0xff] %v153_v3 }
 0x1b2   :  { %158 = vst [vmem:[#allocation8 + $0x10] sm:$0xff] %v154_v4  ;;  %159 = vst [vmem:[#allocation8 + $0x18] sm:$0xff] %v155_v5 }
 0x1b3   :  { %249 = shalt.err (!%p246_p0)
}
 0x1b4   :  { %171 = dma.vmem_to_hbm [thread:$0]  %s166_s22, 512, %s347_s3, [#allocation5], %s266_s0, %s266_s0, %s267_s23  }
 0x1b5   :  { %262 = dma.done.wait [#allocation5], 512  }
 0x1b6   :  { %263 = vsyncadd [#allocation5], 4294966784 }
 0x1b7   :  { %179 = vsyncpa [#allocation4], 1 }
 0x1b8   :  { %180 = vsyncpa [#allocation5], 1 }
 0x1b9   :  { %181 = vsyncpa [#allocation6], 1 }

</bundles_post_ra>
